<compile_context>
chip_gen: v7x
topology: tpu7x:2x2x1
jax: 0.10.0
libtpu: 0.0.40
codegen_flags: <defaults>
</compile_context>

<pallas_src>
import functools
import math

import jax
import jax.numpy as jnp
from jax.experimental import pallas as pl
from jax.experimental.pallas import tpu as pltpu


def _pow_by_int(x, n: int):
    """x ** n for a small positive integer n via VPU multiplies (no EUP)."""
    result = None
    base = x
    while n > 0:
        if n & 1:
            result = base if result is None else result * base
        n >>= 1
        if n:
            base = base * base
    return result


def _gem_kernel(x_ref, o_ref, acc_ref, *, p, inv_hw, eps, hw, hw_block, need_mask):
    j = pl.program_id(1)

    @pl.when(j == 0)
    def _():
        acc_ref[...] = jnp.zeros_like(acc_ref)

    x = x_ref[...].astype(jnp.float32)
    x = jnp.maximum(x, eps)                            # clamp(min=eps)
    if float(p).is_integer() and 1.0 <= p <= 16.0:
        xp = _pow_by_int(x, int(p))                    # VPU multiplies (default p=3)
    else:
        xp = jnp.exp(p * jnp.log(x))                   # generic x ** p (EUP)
    if need_mask:
        col = jax.lax.broadcasted_iota(jnp.int32, xp.shape, 1) + j * hw_block
        xp = jnp.where(col < hw, xp, 0.0)              # mask ragged last HW chunk
    acc_ref[...] += jnp.sum(xp, axis=-1, keepdims=True)

    @pl.when(j == pl.num_programs(1) - 1)
    def _():
        s = acc_ref[...] * inv_hw                      # avg_pool over (H, W)
        if p == 1.0:
            r = s
        else:
            # s >= eps**p may underflow to 0 in f32; exp(log(0)/p) = 0 which
            # matches PyTorch's pow path.
            r = jnp.exp(jnp.log(s) * (1.0 / p))        # s ** (1/p)
        o_ref[...] = r.astype(o_ref.dtype)


def _max_kernel(x_ref, o_ref, acc_ref, *, hw, hw_block, need_mask):
    # p == inf -> global max pool over (H, W).
    j = pl.program_id(1)

    @pl.when(j == 0)
    def _():
        acc_ref[...] = jnp.full_like(acc_ref, -jnp.inf)

    x = x_ref[...].astype(jnp.float32)
    if need_mask:
        col = jax.lax.broadcasted_iota(jnp.int32, x.shape, 1) + j * hw_block
        x = jnp.where(col < hw, x, -jnp.inf)
    acc_ref[...] = jnp.maximum(acc_ref[...], jnp.max(x, axis=-1, keepdims=True))

    @pl.when(j == pl.num_programs(1) - 1)
    def _():
        o_ref[...] = acc_ref[...].astype(o_ref.dtype)


_TILE_BUDGET_BYTES = 8 * 1024 * 1024    # per input tile (Pallas double-buffers it)
_MAX_ROW_BLOCK = 1024
_VMEM_LIMIT_BYTES = 32 * 1024 * 1024    # safe on v5e (128 MiB) .. v7x (64 MiB)


def _choose_blocks(nc: int, hw: int, itemsize: int):
    """Pick (row_block, hw_block) sized to the VMEM tile budget."""
    # Sublane packing multiple: 8 for f32, 16 for bf16, 32 for int8/fp8.
    sub = max(8, 8 * (4 // max(1, itemsize)))

    if nc <= sub:
        row_cap = nc                                   # full row extent
    else:
        row_cap = (min(nc, _MAX_ROW_BLOCK) // sub) * sub

    row_bytes = hw * itemsize
    if row_cap * row_bytes <= _TILE_BUDGET_BYTES:
        return row_cap, hw                             # one HW chunk, max rows
    if sub * row_bytes <= _TILE_BUDGET_BYTES:
        rb = (_TILE_BUDGET_BYTES // row_bytes // sub) * sub
        return min(row_cap, max(sub, rb)), hw          # fewer rows, one HW chunk
    # Enormous spatial map: chunk HW in lane multiples of 128, keep rows large.
    rb = min(row_cap, 256)
    hw_block = max(128, (_TILE_BUDGET_BYTES // (rb * itemsize)) // 128 * 128)
    hw_block = min(hw_block, max(128, (hw // 128) * 128))
    return rb, hw_block


def gem2d(x, p: float = 3.0, eps: float = 1e-07):
    """GeM pooling. x: (N, C, H, W) -> (N, C, 1, 1). p may be math.inf (max pool)."""
    n, c, h, w = x.shape
    nc = n * c
    hw = h * w
    x2 = x.reshape(nc, hw)                             # free reshape (row-major NCHW)

    itemsize = int(jnp.dtype(x.dtype).itemsize)
    row_block, hw_block = _choose_blocks(nc, hw, itemsize)
    need_mask = (hw % hw_block) != 0
    grid = (pl.cdiv(nc, row_block), pl.cdiv(hw, hw_block))

    if p in (math.inf, float("inf")):
        kernel = functools.partial(
            _max_kernel, hw=hw, hw_block=hw_block, need_mask=need_mask)
    else:
        kernel = functools.partial(
            _gem_kernel, p=float(p), inv_hw=1.0 / float(hw), eps=float(eps),
            hw=hw, hw_block=hw_block, need_mask=need_mask)

    out = pl.pallas_call(
        kernel,
        out_shape=jax.ShapeDtypeStruct((nc, 1), x.dtype),
        grid_spec=pltpu.PrefetchScalarGridSpec(
            num_scalar_prefetch=0,
            grid=grid,
            in_specs=[pl.BlockSpec((row_block, hw_block), lambda i, j: (i, j))],
            out_specs=pl.BlockSpec((row_block, 1), lambda i, j: (i, 0)),
            scratch_shapes=[pltpu.VMEM((row_block, 1), jnp.float32)],
        ),
        compiler_params=pltpu.CompilerParams(
            dimension_semantics=("parallel", "arbitrary"),
            vmem_limit_bytes=_VMEM_LIMIT_BYTES,
        ),
    )(x2)

    return out.reshape(n, c, 1, 1)


if __name__ == "__main__":
    # Deterministic parameter setup (p_trainable=False -> p is a plain float).
    P = 3.0
    EPS = 1e-07

    key = jax.random.PRNGKey(0)
    x = jax.random.normal(key, (2, 4, 16, 16), dtype=jnp.float32)

    out = gem2d(x, p=P, eps=EPS)
    out = jax.block_until_ready(out)
    ref = jnp.mean(jnp.maximum(x, EPS) ** P, axis=(2, 3), keepdims=True) ** (1.0 / P)
    assert out.shape == (2, 4, 1, 1), out.shape
    assert jnp.allclose(out, ref, rtol=1e-4, atol=1e-5), (out, ref)

    # p = inf -> global max pool path.
    out_max = jax.block_until_ready(gem2d(x, p=math.inf, eps=EPS))
    ref_max = jnp.max(x, axis=(2, 3), keepdims=True)
    assert jnp.allclose(out_max, ref_max, rtol=1e-5, atol=1e-6)

    # Non-integer p and a row count (N*C = 20) exercising partial edge blocks.
    x2 = jax.random.normal(jax.random.PRNGKey(0), (4, 5, 8, 8), dtype=jnp.float32)
    out2 = jax.block_until_ready(gem2d(x2, p=2.2, eps=EPS))
    ref2 = jnp.mean(jnp.maximum(x2, EPS) ** 2.2, axis=(2, 3), keepdims=True) ** (1.0 / 2.2)
    assert out2.shape == (4, 5, 1, 1), out2.shape
    assert jnp.allclose(out2, ref2, rtol=1e-4, atol=1e-5), (out2, ref2)

    print("KERNEL_OK")
</pallas_src>

<mosaic_0001>
module attributes {stable_mosaic.version = 11 : i64} {
  func.func @_gem_kernel(%arg0: i32, %arg1: i32, %arg2: memref<8x256xf32, #tpu.memory_space<vmem>>, %arg3: memref<8x1xf32, #tpu.memory_space<vmem>>, %arg4: memref<8x1xf32, #tpu.memory_space<vmem>>) attributes {dimension_semantics = [#tpu.dimension_semantics<parallel>, #tpu.dimension_semantics<arbitrary>], iteration_bounds = array<i64: 1, 1>, scalar_prefetch = 0 : i64, scratch_operands = 1 : i64, tpu.core_type = #tpu.core_type<tc>, window_params = [{transform_indices = @transform_0, window_bounds = array<i64: 8, 256>}, {transform_indices = @transform_1, window_bounds = array<i64: 8, 1>}]} {
    %c0_i32 = arith.constant 0 : i32
    %0 = arith.cmpi eq, %arg1, %c0_i32 : i32
    %1 = arith.extui %0 : i1 to i32
    %c0_i32_0 = arith.constant 0 : i32
    %2 = arith.cmpi ne, %1, %c0_i32_0 : i32
    scf.if %2 {
      %cst_9 = arith.constant 0.000000e+00 : f32
      %16 = vector.broadcast %cst_9 : f32 to vector<8x1xf32>
      %c0_10 = arith.constant 0 : index
      %c0_11 = arith.constant 0 : index
      %17 = vector.load %arg4[%c0_10, %c0_11] : memref<8x1xf32, #tpu.memory_space<vmem>>, vector<8x1xf32>
      tpu.vector_store %arg4[%c0_10, %c0_11], %16 {strides = array<i32>} : memref<8x1xf32, #tpu.memory_space<vmem>>, vector<8x1xf32>,
    } else {
    }
    %c0 = arith.constant 0 : index
    %c0_1 = arith.constant 0 : index
    %3 = vector.load %arg2[%c0, %c0_1] : memref<8x256xf32, #tpu.memory_space<vmem>>, vector<8x256xf32>
    %cst = arith.constant 1.000000e-07 : f32
    %4 = vector.broadcast %cst : f32 to vector<8x256xf32>
    %5 = arith.maximumf %3, %4 : vector<8x256xf32>
    %6 = arith.mulf %5, %5 : vector<8x256xf32>
    %7 = arith.mulf %5, %6 : vector<8x256xf32>
    %c0_2 = arith.constant 0 : index
    %c0_3 = arith.constant 0 : index
    %8 = vector.load %arg4[%c0_2, %c0_3] : memref<8x1xf32, #tpu.memory_space<vmem>>, vector<8x1xf32>
    %cst_4 = arith.constant dense<0.000000e+00> : vector<8xf32>
    %9 = vector.multi_reduction <add>, %7, %cst_4 [1] : vector<8x256xf32> to vector<8xf32>
    %10 = vector.shape_cast %9 : vector<8xf32> to vector<8x1xf32>
    %11 = arith.addf %8, %10 : vector<8x1xf32>
    %c0_5 = arith.constant 0 : index
    %c0_6 = arith.constant 0 : index
    %12 = vector.load %arg4[%c0_5, %c0_6] : memref<8x1xf32, #tpu.memory_space<vmem>>, vector<8x1xf32>
    tpu.vector_store %arg4[%c0_5, %c0_6], %11 {strides = array<i32>} : memref<8x1xf32, #tpu.memory_space<vmem>>, vector<8x1xf32>,
    %c0_i32_7 = arith.constant 0 : i32
    %13 = arith.cmpi eq, %arg1, %c0_i32_7 : i32
    %14 = arith.extui %13 : i1 to i32
    %c0_i32_8 = arith.constant 0 : i32
    %15 = arith.cmpi ne, %14, %c0_i32_8 : i32
    scf.if %15 {
      %c0_9 = arith.constant 0 : index
      %c0_10 = arith.constant 0 : index
      %16 = vector.load %arg4[%c0_9, %c0_10] : memref<8x1xf32, #tpu.memory_space<vmem>>, vector<8x1xf32>
      %cst_11 = arith.constant 3.906250e-03 : f32
      %17 = vector.broadcast %cst_11 : f32 to vector<8x1xf32>
      %18 = arith.mulf %16, %17 : vector<8x1xf32>
      %19 = math.log %18 : vector<8x1xf32>
      %cst_12 = arith.constant 0.333333343 : f32
      %20 = vector.broadcast %cst_12 : f32 to vector<8x1xf32>
      %21 = arith.mulf %19, %20 : vector<8x1xf32>
      %22 = math.exp %21 : vector<8x1xf32>
      %c0_13 = arith.constant 0 : index
      %c0_14 = arith.constant 0 : index
      %23 = vector.load %arg3[%c0_13, %c0_14] : memref<8x1xf32, #tpu.memory_space<vmem>>, vector<8x1xf32>
      tpu.vector_store %arg3[%c0_13, %c0_14], %22 {strides = array<i32>} : memref<8x1xf32, #tpu.memory_space<vmem>>, vector<8x1xf32>,
    } else {
    }
    return
  }
  func.func @transform_0(%arg0: i32, %arg1: i32) -> (i32, i32) {
    %c0_i32 = arith.constant 0 : i32
    return %arg0, %arg1 : i32, i32
  }
  func.func @transform_1(%arg0: i32, %arg1: i32) -> (i32, i32) {
    %c0_i32 = arith.constant 0 : i32
    %c0_i32_0 = arith.constant 0 : i32
    return %arg0, %c0_i32 : i32, i32
  }
}

</mosaic_0001>

<bundles_post_ra>
// kernel: tpu_custom_call.1
= control target key start
LH: loop header
LB: loop body
LE: loop exit
PB: predicated region body
PF: predicated region fallthrough
CT: control target
= control target key end

     0   :  { %6 = vsyncpa [#allocation4], 0  ;;  %s87_s6 = smov [#allocation3]   ;;  %s117_s0 = inlined_call_operand.hbm [shape: f32[8,256], index: 0, kind: input, shape index: {}]   ;;  %s118_s1 = inlined_call_operand.vmem [shape: f32[8,1], index: 1, kind: output, shape index: {}]  }
   0x1   :  { %s13_s7 = sshll.u32 %s87_s6, 4  ;;  %s63_s10 = scalar_lea.hbm %s117_s0, 256  ;;  %s14_s7 = int_to_ptr.vmem [resolvable:$true] %s13_s7 }
   0x2   :  { %p64_p0 = scmp.ne.s32.totalorder %s117_s0, %s63_s10  ;;  %p67_p1 = scmp.lt.u32.totalorder %s63_s10, %s117_s0 }
   0x4   :  { %p69_p2 = pnand %p67_p1, %p64_p0 }
   0x6   :  { %72 = shalt.err (!%p69_p2)
}
   0x7   :  { %s73_s15 = scalar_lea.vmem %s14_s7, 256  ;;  %p78_p4 = scmp.lt.s32.totalorder %s14_s7, %s14_s7 }
   0x8   :  { %p74_p3 = scmp.ne.s32.totalorder %s14_s7, %s73_s15  ;;  %p79_p5 = scmp.lt.s32.totalorder %s73_s15, %s73_s15 }
   0xa   :  { %p80_p6 = por %p79_p5, %p78_p4 }
   0xc   :  { %p81_p7 = pnand %p80_p6, %p74_p3 }
   0xe   :  { %84 = shalt.err (!%p81_p7)
}
   0xf   :  { %16 = dma.hbm_to_vmem [thread:$0]  %s117_s0, 256, %s14_s7, [#allocation4]  }
  0x10   :  { %85 = dma.done.wait [#allocation4], 256  }
  0x11   :  { %86 = vsyncadd [#allocation4], 4294967040  ;;  %vm24_vm0 = vcmask 7168   ;;  %v88_v0 = vmov 0.0   ;;  %v26_v1 = vld [vmem:[#allocation3] sm:$0xff]  ;;  %v27_v2 = vld [vmem:[#allocation3 + $0x8] sm:$0xff] }
  0x12   :  { %25 = vst.msk [vmem:[#allocation2] sm:$0xff] %vm24_vm0, %v88_v0  ;;  %v28_v3 = vmax.f32 %v26_v1, 1e-07  ;;  %v29_v4 = vmax.f32 %v27_v2, 1e-07 }
  0x14   :  { %v30_v5 = vmul.f32 %v28_v3, %v28_v3  ;;  %v31_v6 = vmul.f32 %v29_v4, %v29_v4 }
  0x16   :  { %v32_v7 = vmul.f32 %v30_v5, %v28_v3  ;;  %v33_v8 = vmul.f32 %v31_v6, %v29_v4 }
  0x18   :  { %v35_v9 = vadd.f32 %v33_v8, %v32_v7 }
  0x19   :  { %v34_v10 = vld [vmem:[#allocation2] sm:$0xff] }
  0x1a   :  { %36 = vadd.xlane.f32.xlu0 %v35_v9 }
  0xa7   :  { %v37_v11 = vpop.xlane.xlu0 %36 }
  0xa8   :  { %v38_v12 = vadd.f32 %v37_v11, %v34_v10 }
  0xaa   :  { %40 = vst.msk [vmem:[#allocation2] sm:$0xff] %vm24_vm0, %v38_v12 }
  0xb1   :  { %v44_v13 = vld [vmem:[#allocation2] sm:$0xff] }
  0xb2   :  { %v45_v14 = vmul.f32 0.00390625, %v44_v13 }
  0xb4   :  { %59 = vlog2.f32 %v45_v14 }
  0xbe   :  { %v60_v15 = vpop.eup %59 }
  0xbf   :  { %v47_v16 = vmul.f32 0.6931472, %v60_v15 }
  0xc1   :  { %v48_v17 = vmul.f32 0.33333334, %v47_v16 }
  0xc3   :  { %v49_v18 = vmul.f32 1.442695, %v48_v17 }
  0xc5   :  { %61 = vpow2.f32 %v49_v18 }
  0xcf   :  { %v62_v19 = vpop.eup %61 }
  0xd0   :  { %51 = vst.msk [vmem:[%s118_s1] sm:$0xff] %vm24_vm0, %v62_v19 }
  0xd1   :  { %56 = vsyncpa [#allocation4], 1 }

</bundles_post_ra>
